<compile_context>
chip_gen: v7x
topology: tpu7x:2x2x1
jax: 0.10.0
libtpu: 0.0.40
codegen_flags: <defaults>
</compile_context>

<pallas_src>
import jax
import jax.numpy as jnp
from jax.experimental import pallas as pl
from jax.experimental.pallas import tpu as pltpu

IN_DIM = 64    # mlp input features
HID = 256      # mlp output features / SE channels
RED = 16       # SE reduced width: 256 // 16
H_UP = 64      # Upsample target height (width = 1)
LN_EPS = 1e-5

_INV_SQRT2 = 0.7071067811865476
_INV_HID = 1.0 / HID

# Optional numerics knobs (defaults keep exact PyTorch semantics).
USE_TANH_GELU = False      # tanh-approx GELU runs on the otherwise-idle EUP slot
OUT_DTYPE = jnp.float32    # jnp.bfloat16 halves Pallas HBM write traffic if OK downstream


def pse_kernel(x_ref, w_mlp_ref, b_mlp_ref, ln_g_ref, ln_b_ref,
               w_se1_ref, w_se2_ref, o_ref):
    # NOTE: every op below is strictly row-wise.  With a partial last batch
    # tile the padded rows may contain garbage (possibly inf/NaN after
    # rsqrt/sigmoid); that is safe because their stores are dropped, but do
    # NOT add any batch-dim reduction here without masking those rows.

    # ---- mlp: Linear(64, 256) + GELU ----------------------------------------
    x = x_ref[...]                                                    # (TB, 64)
    h = jnp.dot(x, w_mlp_ref[...],
                preferred_element_type=jnp.float32) + b_mlp_ref[...]  # (TB, 256)
    if USE_TANH_GELU:
        g = jax.nn.gelu(h, approximate=True)
    else:
        # exact (erf-based) GELU, matching torch.nn.GELU() default
        g = 0.5 * h * (1.0 + jax.lax.erf(h * _INV_SQRT2))

    # ---- LayerNorm(256): two-pass statistics (numerically robust) -----------
    mean = jnp.sum(g, axis=-1, keepdims=True) * _INV_HID
    d = g - mean
    var = jnp.sum(d * d, axis=-1, keepdims=True) * _INV_HID
    z = d * jax.lax.rsqrt(var + LN_EPS) * ln_g_ref[...] + ln_b_ref[...]

    # ---- SEBlock(256, reduction=16) ------------------------------------------
    # Upsample((64,1)) of a (1,1) spatial map is a broadcast, so the SE
    # AdaptiveAvgPool2d(1) over (H, W) equals z exactly.
    a = jnp.maximum(
        jnp.dot(z, w_se1_ref[...], preferred_element_type=jnp.float32), 0.0)
    s = jax.nn.sigmoid(
        jnp.dot(a, w_se2_ref[...], preferred_element_type=jnp.float32))

    # Gated channel activations; the H-broadcast happens in the wrapper.
    o_ref[...] = (z * s).astype(o_ref.dtype)                          # (TB, 256)


def _round_up(x, m):
    return ((x + m - 1) // m) * m


@jax.jit
def pse_processor(x, params):
    """x: (B, 64) float32  ->  (B, 256, 64, 1) (PyTorch NCHW)."""
    B = x.shape[0]
    # Mem-bound kernel: use the biggest practical batch tile (>=512 rows/step
    # hits ~85% of HBM roofline), but split B over >=2 tiles so the "parallel"
    # grid axis can shard across v7x's two TensorCores.  tb is a multiple of 8
    # (sublane) and capped at 1024 (VMEM footprint a few MiB on every chip).
    tb = min(1024, max(8, _round_up(pl.cdiv(B, 2), 8)))
    grid = (pl.cdiv(B, tb),)

    # Weights / LN params never change across grid steps -> single-buffer them.
    invariant = pl.Buffered(buffer_count=1)

    weight_bytes = 4 * (IN_DIM * HID + 4 * HID + 2 * HID * RED)
    cost = pl.CostEstimate(
        flops=B * (2 * IN_DIM * HID + 4 * HID * RED + 10 * HID),
        transcendentals=B * 2 * HID,                       # erf + sigmoid per channel
        bytes_accessed=B * (IN_DIM + HID) * 4 + weight_bytes,
    )

    scaled = pl.pallas_call(
        pse_kernel,
        out_shape=jax.ShapeDtypeStruct((B, HID), OUT_DTYPE),
        grid_spec=pltpu.PrefetchScalarGridSpec(
            num_scalar_prefetch=0,
            grid=grid,
            in_specs=[
                pl.BlockSpec((tb, IN_DIM), lambda i: (i, 0)),    # x: batch-tiled
                pl.BlockSpec((IN_DIM, HID), lambda i: (0, 0),
                             pipeline_mode=invariant),           # w_mlp
                pl.BlockSpec((1, HID), lambda i: (0, 0),
                             pipeline_mode=invariant),           # b_mlp
                pl.BlockSpec((1, HID), lambda i: (0, 0),
                             pipeline_mode=invariant),           # ln gamma
                pl.BlockSpec((1, HID), lambda i: (0, 0),
                             pipeline_mode=invariant),           # ln beta
                pl.BlockSpec((HID, RED), lambda i: (0, 0),
                             pipeline_mode=invariant),           # w_se1
                pl.BlockSpec((RED, HID), lambda i: (0, 0),
                             pipeline_mode=invariant),           # w_se2
            ],
            out_specs=pl.BlockSpec((tb, HID), lambda i: (i, 0)),
        ),
        compiler_params=pltpu.CompilerParams(
            dimension_semantics=("parallel",),
        ),
        cost_estimate=cost,
    )(x, params["w_mlp"], params["b_mlp"], params["ln_g"], params["ln_b"],
      params["w_se1"], params["w_se2"])

    # Broadcast over the upsampled H axis + NCHW layout; XLA fuses this into
    # the consumer instead of the kernel materializing 64x redundant data.
    return jnp.broadcast_to(scaled[:, :, None, None], (B, HID, H_UP, 1))


def pse_reference(x, params):
    """Pure-JAX reference of the PyTorch forward (for validation)."""
    h = x @ params["w_mlp"] + params["b_mlp"]
    g = 0.5 * h * (1.0 + jax.lax.erf(h / jnp.sqrt(2.0)))
    mean = jnp.mean(g, axis=-1, keepdims=True)
    var = jnp.mean((g - mean) ** 2, axis=-1, keepdims=True)
    z = (g - mean) / jnp.sqrt(var + LN_EPS) * params["ln_g"] + params["ln_b"]
    up = jnp.broadcast_to(z[:, :, None, None], (x.shape[0], HID, H_UP, 1))
    pooled = jnp.mean(up, axis=(2, 3))
    a = jnp.maximum(pooled @ params["w_se1"], 0.0)
    s = jax.nn.sigmoid(a @ params["w_se2"])
    return up * s[:, :, None, None]


def init_params(key):
    k1, k2, k3, k4, k5, k6 = jax.random.split(key, 6)
    return {
        # stored as (in, out) == torch weight (out, in) transposed
        "w_mlp": jax.random.normal(k1, (IN_DIM, HID), jnp.float32) * 0.05,
        "b_mlp": jax.random.normal(k2, (1, HID), jnp.float32) * 0.05,
        "ln_g": 1.0 + jax.random.normal(k3, (1, HID), jnp.float32) * 0.05,
        "ln_b": jax.random.normal(k4, (1, HID), jnp.float32) * 0.05,
        "w_se1": jax.random.normal(k5, (HID, RED), jnp.float32) * 0.05,
        "w_se2": jax.random.normal(k6, (RED, HID), jnp.float32) * 0.05,
    }


if __name__ == "__main__":
    key = jax.random.PRNGKey(0)
    k_x, k_p, k_x2 = jax.random.split(key, 3)
    params = init_params(k_p)

    # Small canonical shape: batch=2 rows of 64 PSE features.
    B = 2
    x = jax.random.normal(k_x, (B, IN_DIM), jnp.float32)
    out = jax.block_until_ready(pse_processor(x, params))
    ref = pse_reference(x, params)
    assert out.shape == (B, HID, H_UP, 1), out.shape
    assert jnp.allclose(out, ref, atol=1e-4, rtol=1e-4), \
        float(jnp.max(jnp.abs(out - ref)))

    # Exercise a multi-step grid (2 tiles, partial last tile) as well.
    B2 = 300
    x2 = jax.random.normal(k_x2, (B2, IN_DIM), jnp.float32)
    out2 = jax.block_until_ready(pse_processor(x2, params))
    ref2 = pse_reference(x2, params)
    assert out2.shape == (B2, HID, H_UP, 1), out2.shape
    assert jnp.allclose(out2, ref2, atol=1e-4, rtol=1e-4), \
        float(jnp.max(jnp.abs(out2 - ref2)))

    print("KERNEL_OK")
</pallas_src>

<mosaic_0001>
module attributes {stable_mosaic.version = 11 : i64} {
  func.func @pse_kernel(%arg0: i32, %arg1: memref<8x64xf32, #tpu.memory_space<vmem>>, %arg2: memref<64x256xf32, #tpu.memory_space<vmem>>, %arg3: memref<1x256xf32, #tpu.memory_space<vmem>>, %arg4: memref<1x256xf32, #tpu.memory_space<vmem>>, %arg5: memref<1x256xf32, #tpu.memory_space<vmem>>, %arg6: memref<256x16xf32, #tpu.memory_space<vmem>>, %arg7: memref<16x256xf32, #tpu.memory_space<vmem>>, %arg8: memref<8x256xf32, #tpu.memory_space<vmem>>) attributes {dimension_semantics = [#tpu.dimension_semantics<parallel>], iteration_bounds = array<i64: 1>, scalar_prefetch = 0 : i64, scratch_operands = 0 : i64, tpu.core_type = #tpu.core_type<tc>, window_params = [{transform_indices = @transform_0, window_bounds = array<i64: 8, 64>}, {pipeline_mode = #tpu.pipeline_mode<synchronous>, transform_indices = @transform_1, window_bounds = array<i64: 64, 256>}, {pipeline_mode = #tpu.pipeline_mode<synchronous>, transform_indices = @transform_2, window_bounds = array<i64: 1, 256>}, {pipeline_mode = #tpu.pipeline_mode<synchronous>, transform_indices = @transform_3, window_bounds = array<i64: 1, 256>}, {pipeline_mode = #tpu.pipeline_mode<synchronous>, transform_indices = @transform_4, window_bounds = array<i64: 1, 256>}, {pipeline_mode = #tpu.pipeline_mode<synchronous>, transform_indices = @transform_5, window_bounds = array<i64: 256, 16>}, {pipeline_mode = #tpu.pipeline_mode<synchronous>, transform_indices = @transform_6, window_bounds = array<i64: 16, 256>}, {transform_indices = @transform_7, window_bounds = array<i64: 8, 256>}]} {
    %c0 = arith.constant 0 : index
    %c0_0 = arith.constant 0 : index
    %0 = vector.load %arg1[%c0, %c0_0] : memref<8x64xf32, #tpu.memory_space<vmem>>, vector<8x64xf32>
    %c0_1 = arith.constant 0 : index
    %c0_2 = arith.constant 0 : index
    %1 = vector.load %arg2[%c0_1, %c0_2] : memref<64x256xf32, #tpu.memory_space<vmem>>, vector<64x256xf32>
    %cst = arith.constant dense<0.000000e+00> : vector<8x256xf32>
    %2 = tpu.matmul %0, %1, %cst {dimension_numbers = #tpu.dot_dimension_numbers<[1], [0], [0], [1], [0, 0, 1, 1], [], []>} : vector<8x64xf32>, vector<64x256xf32>, vector<8x256xf32> -> vector<8x256xf32>
    %c0_3 = arith.constant 0 : index
    %c0_4 = arith.constant 0 : index
    %3 = vector.load %arg3[%c0_3, %c0_4] : memref<1x256xf32, #tpu.memory_space<vmem>>, vector<1x256xf32>
    %4 = vector.broadcast %3 : vector<1x256xf32> to vector<8x256xf32>
    %5 = arith.addf %2, %4 : vector<8x256xf32>
    %cst_5 = arith.constant 5.000000e-01 : f32
    %6 = vector.broadcast %cst_5 : f32 to vector<8x256xf32>
    %7 = arith.mulf %6, %5 : vector<8x256xf32>
    %cst_6 = arith.constant 0.707106769 : f32
    %8 = vector.broadcast %cst_6 : f32 to vector<8x256xf32>
    %9 = arith.mulf %5, %8 : vector<8x256xf32>
    %10 = math.erf %9 : vector<8x256xf32>
    %cst_7 = arith.constant 1.000000e+00 : f32
    %11 = vector.broadcast %cst_7 : f32 to vector<8x256xf32>
    %12 = arith.addf %11, %10 : vector<8x256xf32>
    %13 = arith.mulf %7, %12 : vector<8x256xf32>
    %cst_8 = arith.constant dense<0.000000e+00> : vector<8xf32>
    %14 = vector.multi_reduction <add>, %13, %cst_8 [1] : vector<8x256xf32> to vector<8xf32>
    %15 = vector.shape_cast %14 : vector<8xf32> to vector<8x1xf32>
    %cst_9 = arith.constant 3.906250e-03 : f32
    %16 = vector.broadcast %cst_9 : f32 to vector<8x1xf32>
    %17 = arith.mulf %15, %16 : vector<8x1xf32>
    %18 = vector.broadcast %17 : vector<8x1xf32> to vector<8x256xf32>
    %19 = arith.subf %13, %18 : vector<8x256xf32>
    %20 = arith.mulf %19, %19 : vector<8x256xf32>
    %cst_10 = arith.constant dense<0.000000e+00> : vector<8xf32>
    %21 = vector.multi_reduction <add>, %20, %cst_10 [1] : vector<8x256xf32> to vector<8xf32>
    %22 = vector.shape_cast %21 : vector<8xf32> to vector<8x1xf32>
    %cst_11 = arith.constant 3.906250e-03 : f32
    %23 = vector.broadcast %cst_11 : f32 to vector<8x1xf32>
    %24 = arith.mulf %22, %23 : vector<8x1xf32>
    %cst_12 = arith.constant 9.99999974E-6 : f32
    %25 = vector.broadcast %cst_12 : f32 to vector<8x1xf32>
    %26 = arith.addf %24, %25 : vector<8x1xf32>
    %27 = math.rsqrt %26 : vector<8x1xf32>
    %28 = vector.broadcast %27 : vector<8x1xf32> to vector<8x256xf32>
    %29 = arith.mulf %19, %28 : vector<8x256xf32>
    %c0_13 = arith.constant 0 : index
    %c0_14 = arith.constant 0 : index
    %30 = vector.load %arg4[%c0_13, %c0_14] : memref<1x256xf32, #tpu.memory_space<vmem>>, vector<1x256xf32>
    %31 = vector.broadcast %30 : vector<1x256xf32> to vector<8x256xf32>
    %32 = arith.mulf %29, %31 : vector<8x256xf32>
    %c0_15 = arith.constant 0 : index
    %c0_16 = arith.constant 0 : index
    %33 = vector.load %arg5[%c0_15, %c0_16] : memref<1x256xf32, #tpu.memory_space<vmem>>, vector<1x256xf32>
    %34 = vector.broadcast %33 : vector<1x256xf32> to vector<8x256xf32>
    %35 = arith.addf %32, %34 : vector<8x256xf32>
    %c0_17 = arith.constant 0 : index
    %c0_18 = arith.constant 0 : index
    %36 = vector.load %arg6[%c0_17, %c0_18] : memref<256x16xf32, #tpu.memory_space<vmem>>, vector<256x16xf32>
    %cst_19 = arith.constant dense<0.000000e+00> : vector<8x16xf32>
    %37 = tpu.matmul %35, %36, %cst_19 {dimension_numbers = #tpu.dot_dimension_numbers<[1], [0], [0], [1], [0, 0, 1, 1], [], []>} : vector<8x256xf32>, vector<256x16xf32>, vector<8x16xf32> -> vector<8x16xf32>
    %cst_20 = arith.constant 0.000000e+00 : f32
    %38 = vector.broadcast %cst_20 : f32 to vector<8x16xf32>
    %39 = arith.maximumf %37, %38 : vector<8x16xf32>
    %c0_21 = arith.constant 0 : index
    %c0_22 = arith.constant 0 : index
    %40 = vector.load %arg7[%c0_21, %c0_22] : memref<16x256xf32, #tpu.memory_space<vmem>>, vector<16x256xf32>
    %cst_23 = arith.constant dense<0.000000e+00> : vector<8x256xf32>
    %41 = tpu.matmul %39, %40, %cst_23 {dimension_numbers = #tpu.dot_dimension_numbers<[1], [0], [0], [1], [0, 0, 1, 1], [], []>} : vector<8x16xf32>, vector<16x256xf32>, vector<8x256xf32> -> vector<8x256xf32>
    %42 = arith.negf %41 : vector<8x256xf32>
    %43 = math.exp %42 : vector<8x256xf32>
    %cst_24 = arith.constant 1.000000e+00 : f32
    %44 = vector.broadcast %cst_24 : f32 to vector<8x256xf32>
    %45 = arith.addf %44, %43 : vector<8x256xf32>
    %46 = arith.divf %44, %45 : vector<8x256xf32>
    %47 = arith.mulf %35, %46 : vector<8x256xf32>
    %c0_25 = arith.constant 0 : index
    %c0_26 = arith.constant 0 : index
    %48 = vector.load %arg8[%c0_25, %c0_26] : memref<8x256xf32, #tpu.memory_space<vmem>>, vector<8x256xf32>
    tpu.vector_store %arg8[%c0_25, %c0_26], %47 {strides = array<i32>} : memref<8x256xf32, #tpu.memory_space<vmem>>, vector<8x256xf32>,
    return
  }
  func.func @transform_0(%arg0: i32) -> (i32, i32) {
    %c0_i32 = arith.constant 0 : i32
    %c0_i32_0 = arith.constant 0 : i32
    return %arg0, %c0_i32 : i32, i32
  }
  func.func @transform_1(%arg0: i32) -> (i32, i32) {
    %c0_i32 = arith.constant 0 : i32
    %c0_i32_0 = arith.constant 0 : i32
    %c0_i32_1 = arith.constant 0 : i32
    return %c0_i32, %c0_i32_0 : i32, i32
  }
  func.func @transform_2(%arg0: i32) -> (i32, i32) {
    %c0_i32 = arith.constant 0 : i32
    %c0_i32_0 = arith.constant 0 : i32
    %c0_i32_1 = arith.constant 0 : i32
    return %c0_i32, %c0_i32_0 : i32, i32
  }
  func.func @transform_3(%arg0: i32) -> (i32, i32) {
    %c0_i32 = arith.constant 0 : i32
    %c0_i32_0 = arith.constant 0 : i32
    %c0_i32_1 = arith.constant 0 : i32
    return %c0_i32, %c0_i32_0 : i32, i32
  }
  func.func @transform_4(%arg0: i32) -> (i32, i32) {
    %c0_i32 = arith.constant 0 : i32
    %c0_i32_0 = arith.constant 0 : i32
    %c0_i32_1 = arith.constant 0 : i32
    return %c0_i32, %c0_i32_0 : i32, i32
  }
  func.func @transform_5(%arg0: i32) -> (i32, i32) {
    %c0_i32 = arith.constant 0 : i32
    %c0_i32_0 = arith.constant 0 : i32
    %c0_i32_1 = arith.constant 0 : i32
    return %c0_i32, %c0_i32_0 : i32, i32
  }
  func.func @transform_6(%arg0: i32) -> (i32, i32) {
    %c0_i32 = arith.constant 0 : i32
    %c0_i32_0 = arith.constant 0 : i32
    %c0_i32_1 = arith.constant 0 : i32
    return %c0_i32, %c0_i32_0 : i32, i32
  }
  func.func @transform_7(%arg0: i32) -> (i32, i32) {
    %c0_i32 = arith.constant 0 : i32
    %c0_i32_0 = arith.constant 0 : i32
    return %arg0, %c0_i32 : i32, i32
  }
}

</mosaic_0001>

<bundles_post_ra>
// kernel: pse_processor.1
= control target key start
LH: loop header
LB: loop body
LE: loop exit
PB: predicated region body
PF: predicated region fallthrough
CT: control target
= control target key end

     0   :  { %v556_v7 = vmov 0.0   ;;  %vm55_vm0 = vcmask 523264   ;;  %v45_v26 = vlaneseq  ;;  %vm291_vm1 = vcmask 130048   ;;  %s778_s0 = inlined_call_operand.vmem [shape: f32[2,64], index: 0, kind: input, shape index: {}]   ;;  %s779_s1 = inlined_call_operand.vmem [shape: f32[64,256], index: 1, kind: input, shape index: {}]   ;;  %s780_s2 = inlined_call_operand.vmem [shape: f32[1,256], index: 2, kind: input, shape index: {}]   ;;  %s781_s3 = inlined_call_operand.vmem [shape: f32[1,256], index: 3, kind: input, shape index: {}]   ;;  %s782_s4 = inlined_call_operand.vmem [shape: f32[1,256], index: 4, kind: input, shape index: {}]   ;;  %s783_s5 = inlined_call_operand.vmem [shape: f32[256,16], index: 5, kind: input, shape index: {}]   ;;  %s784_s6 = inlined_call_operand.vmem [shape: f32[16,256], index: 6, kind: input, shape index: {}]   ;;  %s785_s7 = inlined_call_operand.vmem [shape: f32[2,256], index: 7, kind: output, shape index: {}]  }
   0x1   :  { %v28_v0 = vld [vmem:[%s779_s1 + $0x8] sm:$0xff]  ;;  %v30_v1 = vld [vmem:[%s779_s1 + $0x18] sm:$0xff]  ;;  %v27_v2 = vld [vmem:[%s779_s1] sm:$0xff]  ;;  %123 = vmatprep.mubr.f32.mxu0 %v556_v7 }
   0x2   :  { %v488_v3 = vpack.c.bf16 %v30_v1, %v28_v0  ;;  %v29_v4 = vld [vmem:[%s779_s1 + $0x10] sm:$0xff]  ;;  %v32_v5 = vld [vmem:[%s779_s1 + $0x28] sm:$0xff]  ;;  %v34_v6 = vld [vmem:[%s779_s1 + $0x38] sm:$0xff]  ;;  %v46_v27 = vshrl.u32 %v45_v26, 7 }
   0x3   :  { %v490_v8 = vpack.c.bf16 %v29_v4, %v27_v2  ;;  %v492_v9 = vpack.c.bf16 %v34_v6, %v32_v5  ;;  %v31_v10 = vld [vmem:[%s779_s1 + $0x20] sm:$0xff]  ;;  %v33_v11 = vld [vmem:[%s779_s1 + $0x30] sm:$0xff]  ;;  %v36_v12 = vld [vmem:[%s779_s1 + $0x48] sm:$0xff] }
   0x4   :  { %489 = vmatprep.subr.bf16.mxu0 %v488_v3  ;;  %v38_v13 = vld [vmem:[%s779_s1 + $0x58] sm:$0xff]  ;;  %v494_v14 = vpack.c.bf16 %v33_v11, %v31_v10  ;;  %v35_v16 = vld [vmem:[%s779_s1 + $0x40] sm:$0xff]  ;;  %v37_v17 = vld [vmem:[%s779_s1 + $0x50] sm:$0xff]  ;;  %v648_v28 = vsub.s32 0, %v46_v27  ;;  %v653_v30 = vsub.s32 1, %v46_v27 }
   0x5   :  { %491 = vmatpush1.bf16.msra.mxu0 %v490_v8  ;;  %v496_v15 = vpack.c.bf16 %v38_v13, %v36_v12  ;;  %v40_v18 = vld [vmem:[%s779_s1 + $0x68] sm:$0xff]  ;;  %v42_v19 = vld [vmem:[%s779_s1 + $0x78] sm:$0xff]  ;;  %v498_v20 = vpack.c.bf16 %v37_v17, %v35_v16  ;;  %v39_v22 = vld [vmem:[%s779_s1 + $0x60] sm:$0xff] }
   0x6   :  { %493 = vmatprep.subr.bf16.mxu0 %v492_v9  ;;  %v500_v21 = vpack.c.bf16 %v42_v19, %v40_v18  ;;  %v41_v23 = vld [vmem:[%s779_s1 + $0x70] sm:$0xff]  ;;  %v26_v25 = vld [vmem:[%s778_s0] sm:$0xff]  ;;  %v201_v49 = vld [vmem:[%s783_s5 + $0x88] sm:$0xff] }
   0x7   :  { %v502_v24 = vpack.c.bf16 %v41_v23, %v39_v22  ;;  %v43_v29 = vld [vmem:[%s780_s2] sm:$0x3]  ;;  %v185_v52 = vld [vmem:[%s783_s5 + $0x8] sm:$0xff]  ;;  %v202_v53 = vld [vmem:[%s783_s5 + $0x90] sm:$0xff] }
   0x8   :  { %v48_v31 = vrot.slane %v43_v29, %v648_v28  ;;  %v52_v32 = vrot.slane %v43_v29, %v653_v30  ;;  %v200_v48 = vld [vmem:[%s783_s5 + $0x80] sm:$0xff]  ;;  %v203_v54 = vld [vmem:[%s783_s5 + $0x98] sm:$0xff]  ;;  %v186_v57 = vld [vmem:[%s783_s5 + $0x10] sm:$0xff] }
   0x9   :  { %495 = vmatpush1.bf16.msra.mxu0 %v494_v14  ;;  %v184_v50 = vld [vmem:[%s783_s5] sm:$0xff]  ;;  %v504_v51 = vpack.c.bf16 %v201_v49, %v200_v48  ;;  %v508_v56 = vpack.c.bf16 %v203_v54, %v202_v53  ;;  %v187_v58 = vld [vmem:[%s783_s5 + $0x18] sm:$0xff]  ;;  %v205_v60 = vld [vmem:[%s783_s5 + $0xa8] sm:$0xff] }
   0xa   :  { %497 = vmatprep.subr.bf16.mxu0 %v496_v15  ;;  %v506_v55 = vpack.c.bf16 %v185_v52, %v184_v50  ;;  %v204_v59 = vld [vmem:[%s783_s5 + $0xa0] sm:$0xff]  ;;  %v510_v61 = vpack.c.bf16 %v187_v58, %v186_v57  ;;  %v189_v0 = vld [vmem:[%s783_s5 + $0x28] sm:$0xff]  ;;  %v206_v9 = vld [vmem:[%s783_s5 + $0xb0] sm:$0xff] }
   0xb   :  { %505 = vmatprep.subr.bf16.mxu1 %v504_v51  ;;  %v512_v62 = vpack.c.bf16 %v205_v60, %v204_v59  ;;  %v188_v63 = vld [vmem:[%s783_s5 + $0x20] sm:$0xff]  ;;  %v207_v10 = vld [vmem:[%s783_s5 + $0xb8] sm:$0xff]  ;;  %v190_v12 = vld [vmem:[%s783_s5 + $0x30] sm:$0xff] }
   0xc   :  { %507 = vmatpush3.bf16.msra.mxu1 %v506_v55  ;;  %v514_v1 = vpack.c.bf16 %v189_v0, %v188_v63  ;;  %v516_v11 = vpack.c.bf16 %v207_v10, %v206_v9  ;;  %v191_v13 = vld [vmem:[%s783_s5 + $0x38] sm:$0xff]  ;;  %v208_v15 = vld [vmem:[%s783_s5 + $0xc0] sm:$0xff]  ;;  %v209_v16 = vld [vmem:[%s783_s5 + $0xc8] sm:$0xff] }
   0xd   :  { %499 = vmatpush1.bf16.msra.mxu0 %v498_v20  ;;  %509 = vmatprep.subr.bf16.mxu1 %v508_v56  ;;  %v518_v14 = vpack.c.bf16 %v191_v13, %v190_v12  ;;  %v520_v17 = vpack.c.bf16 %v209_v16, %v208_v15  ;;  %v192_v18 = vld [vmem:[%s783_s5 + $0x40] sm:$0xff]  ;;  %v193_v19 = vld [vmem:[%s783_s5 + $0x48] sm:$0xff]  ;;  %v210_v20 = vld [vmem:[%s783_s5 + $0xd0] sm:$0xff] }
   0xe   :  { %501 = vmatprep.subr.bf16.mxu0 %v500_v21  ;;  %v522_v21 = vpack.c.bf16 %v193_v19, %v192_v18  ;;  %v211_v22 = vld [vmem:[%s783_s5 + $0xd8] sm:$0xff]  ;;  %v194_v23 = vld [vmem:[%s783_s5 + $0x50] sm:$0xff]  ;;  %v212_v26 = vld [vmem:[%s783_s5 + $0xe0] sm:$0xff] }
   0xf   :  { %v213_v27 = vld [vmem:[%s783_s5 + $0xe8] sm:$0xff]  ;;  %v290_v58 = vld [vmem:[%s784_s6 + $0x18] sm:$0xff] }
  0x10   :  { %511 = vmatpush3.bf16.msra.mxu1 %v510_v61  ;;  %v288_v57 = vld [vmem:[%s784_s6 + $0x8] sm:$0xff] }
  0x11   :  { %503 = vmatpush1.bf16.msra.mxu0 %v502_v24  ;;  %513 = vmatprep.subr.bf16.mxu1 %v512_v62  ;;  %v195_v24 = vld [vmem:[%s783_s5 + $0x58] sm:$0xff]  ;;  %v536_v59 = vpack.c.bf16 %v290_v58, %v288_v57 }
  0x12   :  { %v526_v29 = vpack.c.bf16 %v195_v24, %v194_v23 }
  0x13   :  { %537 = vmatprep.subr.bf16.mxu0 %v536_v59 }
  0x14   :  { %447 = vmatmul.mubr.msk.f32.vlgmr.msra.gmra.mrb[0].mxu0 %vm55_vm0, %v26_v25  ;;  %515 = vmatpush3.bf16.msra.mxu1 %v514_v1  ;;  %v524_v25 = vpack.c.bf16 %v211_v22, %v210_v20 }
  0x15   :  { %359 = vmatprep.mubr.f32.mxu0 %v556_v7  ;;  %517 = vmatprep.subr.bf16.mxu1 %v516_v11 }
  0x18   :  { %519 = vmatpush3.bf16.msra.mxu1 %v518_v14 }
  0x19   :  { %521 = vmatprep.subr.bf16.mxu1 %v520_v17 }
  0x1c   :  { %523 = vmatpush3.bf16.msra.mxu1 %v522_v21 }
  0x1d   :  { %525 = vmatprep.subr.bf16.mxu1 %v524_v25 }
  0x20   :  { %527 = vmatpush3.bf16.msra.mxu1 %v526_v29 }
  0xe7   :  { %v125_v33 = vpop.f32.mrb[0].mxu0 }
  0xe8   :  { %v126_v34 = vadd.f32 %v125_v33, %v48_v31  ;;  %v127_v35 = vpop.f32.mrb[1].mxu0  ;;  %v528_v31 = vpack.c.bf16 %v213_v27, %v212_v26  ;;  %v197_v33 = vld [vmem:[%s783_s5 + $0x68] sm:$0xff] }
  0xe9   :  { %v128_v36 = vadd.f32 %v127_v35, %v52_v32  ;;  %v196_v32 = vld [vmem:[%s783_s5 + $0x60] sm:$0xff]  ;;  %v215_v35 = vld [vmem:[%s783_s5 + $0xf8] sm:$0xff] }
  0xea   :  { %v132_v37 = vmul.f32 0.70710677, %v126_v34  ;;  %v130_v41 = vmul.f32 0.5, %v126_v34  ;;  %v214_v34 = vld [vmem:[%s783_s5 + $0xf0] sm:$0xff]  ;;  %529 = vmatprep.subr.bf16.mxu1 %v528_v31 }
  0xeb   :  { %v133_v38 = vmul.f32 0.70710677, %v128_v36  ;;  %v131_v43 = vmul.f32 0.5, %v128_v36  ;;  %v530_v36 = vpack.c.bf16 %v197_v33, %v196_v32 }
  0xec   :  { %542 = verf.f32 %v132_v37  ;;  %v532_v37 = vpack.c.bf16 %v215_v35, %v214_v34 }
  0xed   :  { %544 = verf.f32 %v133_v38  ;;  %v198_v38 = vld [vmem:[%s783_s5 + $0x70] sm:$0xff]  ;;  %531 = vmatpush3.bf16.msra.mxu1 %v530_v36 }
  0xee   :  { %533 = vmatprep.subr.bf16.mxu1 %v532_v37 }
  0xf6   :  { %v543_v39 = vpop.eup %542 }
  0xf7   :  { %v545_v40 = vpop.eup %544  ;;  %v136_v42 = vadd.f32 1.0, %v543_v39  ;;  %v199_v39 = vld [vmem:[%s783_s5 + $0x78] sm:$0xff] }
  0xf8   :  { %v137_v44 = vadd.f32 1.0, %v545_v40  ;;  %v534_v40 = vpack.c.bf16 %v199_v39, %v198_v38 }
  0xf9   :  { %v138_v45 = vmul.f32 %v136_v42, %v130_v41 }
  0xfa   :  { %v139_v46 = vmul.f32 %v137_v44, %v131_v43  ;;  %535 = vmatpush3.bf16.msra.mxu1 %v534_v40  ;;  %v156_v44 = vld [vmem:[%s781_s3] sm:$0x3] }
  0xfc   :  { %v140_v47 = vadd.f32 %v139_v46, %v138_v45 }
  0xfe   :  { %141 = vadd.xlane.f32.xlu0 %v140_v47  ;;  %v165_v47 = vrot.slane %v156_v44, %v653_v30 }
 0x18b   :  { %v142_v2 = vpop.xlane.xlu0 %141 }
 0x18c   :  { %v143_v3 = vmul.f32 0.00390625, %v142_v2 }
 0x18e   :  { %v144_v4 = vsub.f32 %v138_v45, %v143_v3  ;;  %v145_v5 = vsub.f32 %v139_v46, %v143_v3  ;;  %v170_v45 = vld [vmem:[%s782_s4] sm:$0x3]  ;;  %v161_v46 = vrot.slane %v156_v44, %v648_v28 }
 0x18f   :  { %v175_v50 = vrot.slane %v170_v45, %v648_v28  ;;  %v179_v51 = vrot.slane %v170_v45, %v653_v30  ;;  %v287_v28 = vld [vmem:[%s784_s6] sm:$0xff]  ;;  %v289_v30 = vld [vmem:[%s784_s6 + $0x10] sm:$0xff] }
 0x190   :  { %v146_v6 = vmul.f32 %v144_v4, %v144_v4  ;;  %v147_v7 = vmul.f32 %v145_v5, %v145_v5  ;;  %v538_v60 = vpack.c.bf16 %v289_v30, %v287_v28 }
 0x192   :  { %v148_v8 = vadd.f32 %v147_v7, %v146_v6  ;;  %539 = vmatpush1.bf16.msra.mxu0 %v538_v60 }
 0x194   :  { %149 = vadd.xlane.f32.xlu0 %v148_v8 }
 0x221   :  { %v150_v41 = vpop.xlane.xlu0 %149 }
 0x222   :  { %v151_v42 = vmul.f32 0.00390625, %v150_v41 }
 0x224   :  { %v152_v43 = vadd.f32 1e-05, %v151_v42 }
 0x226   :  { %546 = vrsqrt.f32 %v152_v43 }
 0x230   :  { %v547_v48 = vpop.eup %546 }
 0x231   :  { %v155_v49 = vmul.f32 %v547_v48, %v145_v5  ;;  %v154_v52 = vmul.f32 %v547_v48, %v144_v4 }
 0x233   :  { %v169_v53 = vmul.f32 %v165_v47, %v155_v49  ;;  %v168_v54 = vmul.f32 %v161_v46, %v154_v52 }
 0x235   :  { %v183_v55 = vadd.f32 %v179_v51, %v169_v53  ;;  %v182_v56 = vadd.f32 %v175_v50, %v168_v54 }
 0x237   :  { %280 = vmatprep.mubr.f32.mxu1 %v183_v55 }
 0x238   :  { %281 = vmatmul.mubr.f32.vlgmr.msra.gmra.mrb[0].mxu1 %v182_v56 }
 0x30b   :  { %v485_v61 = vpop.f32.mrb[0].mxu1 }
 0x30c   :  { %v486_v62 = vpop.f32.mrb[1].mxu1 }
 0x30d   :  { %v487_v63 = vadd.f32 %v486_v62, %v485_v61 }
 0x30f   :  { %v286_v0 = vmax.f32 %v487_v63, 0.0 }
 0x311   :  { %448 = vmatmul.mubr.msk.f32.vlgmr.msra.gmra.mrb[2].mxu0 %vm291_vm1, %v286_v0 }
 0x3e4   :  { %v361_v1 = vpop.f32.mrb[2].mxu0 }
 0x3e5   :  { %v449_v2 = vmul.f32 -1.442695, %v361_v1  ;;  %v363_v3 = vpop.f32.mrb[3].mxu0 }
 0x3e6   :  { %v450_v4 = vmul.f32 -1.442695, %v363_v3 }
 0x3e7   :  { %548 = vpow2.f32 %v449_v2 }
 0x3e8   :  { %550 = vpow2.f32 %v450_v4 }
 0x3f1   :  { %v549_v5 = vpop.eup %548 }
 0x3f2   :  { %v551_v6 = vpop.eup %550  ;;  %v372_v7 = vadd.f32 1.0, %v549_v5 }
 0x3f3   :  { %v373_v8 = vadd.f32 1.0, %v551_v6 }
 0x3f4   :  { %552 = vrcp.f32 %v372_v7 }
 0x3f5   :  { %554 = vrcp.f32 %v373_v8 }
 0x3fe   :  { %v553_v9 = vpop.eup %552 }
 0x3ff   :  { %v555_v10 = vpop.eup %554  ;;  %v378_v11 = vmul.f32 %v553_v9, %v182_v56 }
 0x400   :  { %v379_v12 = vmul.f32 %v555_v10, %v183_v55 }
 0x402   :  { %v382_v13 = vcombine.low %v378_v11, %v379_v12 }
 0x404   :  { %451 = vst.sshfl [vmem:[#allocation2] sm:$0x33 pattern:$0x76325410] %v382_v13 }
 0x40b   :  { %v425_v14 = vld [vmem:[#allocation2] sm:$0xf] }
 0x40c   :  { %426 = vst [vmem:[%s785_s7] sm:$0xf] %v425_v14 }

</bundles_post_ra>
